<compile_context>
chip_gen: v5e
topology: v5e:2x2
jax: 0.10.0
libtpu: 0.0.40
codegen_flags: <defaults>
</compile_context>

<pallas_src>
import functools

import jax
import jax.numpy as jnp
from jax.experimental import pallas as pl
from jax.experimental.pallas import tpu as pltpu


def decoder_kernel(h_ref, w_ref, b_ref, o_ref):
    # h_ref: (B, H)  resident across all grid steps (constant index_map)
    # w_ref: (H, TN) tile of the predicted weight matrix (native dtype)
    # b_ref: (1, TN) bias tile
    # o_ref: (B, TN) output tile
    h = h_ref[...]
    w = w_ref[...]
    if h.dtype != w.dtype:
        # Cast only the tiny (B, H) activation block; the big weight tile goes
        # into the MXU in its native dtype (bf16/f32) with f32 accumulation.
        h = h.astype(w.dtype)
    acc = jnp.dot(h, w, preferred_element_type=jnp.float32)
    o_ref[...] = (acc + b_ref[...].astype(jnp.float32)).astype(o_ref.dtype)


def _round_up(x, m):
    return pl.cdiv(x, m) * m


@functools.lru_cache(maxsize=1)
def _chip_info():
    """Returns (physical VMEM bytes per TensorCore, megacore flag)."""
    vmem = 64 << 20          # conservative default (v7x per-TC VMEM)
    two_cores = False
    try:
        info = pltpu.get_tpu_info()
        vmem = int(getattr(info, "vmem_capacity_bytes", vmem))
    except Exception:
        pass
    try:
        kind = jax.devices()[0].device_kind.lower()
        two_cores = "v7" in kind           # v7x: 2 TensorCores share the grid
    except Exception:
        pass
    return vmem, two_cores


def _auto_tile_lanes(B, H, f_lanes, h_bytes, w_bytes, o_bytes,
                     vmem_budget, n_buf, two_cores):
    """Pick the feature (lane) tile width against a VMEM byte budget."""
    fixed = 2 * B * H * h_bytes            # resident hidden_rep (dbl-buffered alloc)
    per_lane = (n_buf * H * w_bytes        # weight buffers
                + 2 * B * o_bytes          # output double buffer
                + 2 * 8 * 4)               # bias double buffer (sublane-padded)
    tn = max(vmem_budget - fixed, 0) // max(per_lane, 1)
    tn = max(128, (tn // 128) * 128)
    tn = min(tn, f_lanes)
    if two_cores and f_lanes > 128:
        # Both TensorCores of a megacore chip shard the "parallel" axis:
        # force >= 2 grid steps and prefer an even split (avoid 2-vs-1 skew).
        steps = max(2, pl.cdiv(f_lanes, tn))
        if steps % 2:
            steps += 1
        tn = min(tn, max(128, pl.cdiv(pl.cdiv(f_lanes, steps), 128) * 128))
    return tn


def _weight_spec(H, tn, n_buf):
    idx = lambda j: (0, j)
    if n_buf > 2:
        try:
            # Deeper pipelining on the weight stream: compute per step is tiny,
            # so a 3rd buffer keeps the DMA engine continuously busy.
            return pl.BlockSpec((H, tn), idx, pipeline_mode=pl.Buffered(n_buf))
        except TypeError:
            pass
    return pl.BlockSpec((H, tn), idx)


@functools.partial(jax.jit, static_argnames=("tn", "weight_buffers"))
def decoder_forward(hidden_rep, wpn_out, bias, *, tn=None, weight_buffers=3):
    """hidden_rep: (B, H), wpn_out: (H, F) [f32 or bf16], bias: (F,) -> (B, F).

    Weights are consumed in their native dtype (pass bf16 from the WPN producer
    to halve HBM traffic on the dominant operand).
    """
    B, H = hidden_rep.shape
    H2, F = wpn_out.shape
    assert H == H2 and bias.shape == (F,)

    h_bytes = jnp.dtype(hidden_rep.dtype).itemsize
    w_bytes = jnp.dtype(wpn_out.dtype).itemsize
    o_bytes = h_bytes                       # output keeps hidden_rep's dtype

    vmem_phys, two_cores = _chip_info()
    # Tile-sizing budget: ~half of physical VMEM, capped
    # (v5e/v6e: 56 MiB of 128 MiB; v7x: 32 MiB of 64 MiB).
    vmem_budget = min(vmem_phys // 2, 56 << 20)

    f_lanes = _round_up(F, 128)

    if tn is None:
        n_buf = max(2, weight_buffers)
        tn = _auto_tile_lanes(B, H, f_lanes, h_bytes, w_bytes, o_bytes,
                              vmem_budget, n_buf, two_cores)
        # Don't budget / pipeline more weight buffers than there are steps.
        n_buf = min(n_buf, max(2, pl.cdiv(F, tn)))
        tn = _auto_tile_lanes(B, H, f_lanes, h_bytes, w_bytes, o_bytes,
                              vmem_budget, n_buf, two_cores)
    else:
        tn = max(128, min(_round_up(tn, 128), f_lanes))
        n_buf = max(2, weight_buffers)

    grid = pl.cdiv(F, tn)
    n_buf = min(n_buf, max(2, grid))

    # The big (H, F) operand is streamed UNPADDED: the partial edge tile only
    # feeds out-of-range output lanes, which Pallas masks on store. Only the
    # tiny bias is padded to a whole number of tiles.
    f_bias = grid * tn
    bias2d = (jnp.pad(bias, (0, f_bias - F)) if f_bias != F else bias).reshape(1, f_bias)

    # VMEM estimate -> explicit scoped-VMEM limit (v5e's scoped default is only
    # 16 MiB); generation-aware cap (<= 3/4 of physical VMEM, <= 64 MiB).
    est = (n_buf * H * tn * w_bytes
           + 2 * B * tn * o_bytes
           + 2 * 8 * tn * 4
           + 2 * B * H * h_bytes)
    vmem_limit = int(min(min(vmem_phys * 3 // 4, 64 << 20),
                         max(24 << 20, est * 3 // 2)))

    # Advise XLA that this custom call is bandwidth-heavy so surrounding ops
    # (e.g. the WPN producer) can be overlapped with it.
    cost = pl.CostEstimate(
        flops=2 * B * H * F,
        transcendentals=0,
        bytes_accessed=H * F * w_bytes + B * F * o_bytes + B * H * h_bytes + F * 4,
    )

    return pl.pallas_call(
        decoder_kernel,
        out_shape=jax.ShapeDtypeStruct((B, F), hidden_rep.dtype),
        grid_spec=pltpu.PrefetchScalarGridSpec(
            num_scalar_prefetch=0,
            grid=(grid,),
            in_specs=[
                # hidden_rep: same (B, H) block every step -> stays resident.
                pl.BlockSpec((B, H), lambda j: (0, 0)),
                # weight: large lane-dense tile of the feature axis.
                _weight_spec(H, tn, n_buf),
                # bias: one small tile per step (negligible traffic).
                pl.BlockSpec((1, tn), lambda j: (0, j)),
            ],
            out_specs=pl.BlockSpec((B, tn), lambda j: (0, j)),
        ),
        compiler_params=pltpu.CompilerParams(
            dimension_semantics=("parallel",),
            vmem_limit_bytes=vmem_limit,
        ),
        cost_estimate=cost,
    )(hidden_rep, wpn_out, bias2d)


if __name__ == "__main__":
    key = jax.random.PRNGKey(0)
    k_h, k_w = jax.random.split(key)

    # Small shapes consistent with the module: batch=8, hidden_dim=32,
    # num_features=384.
    B, H, F = 8, 32, 384
    hidden_rep = jax.random.normal(k_h, (B, H), dtype=jnp.float32)
    # Simulated WPN output (DietNetwork weight-prediction network result).
    wpn_out = jax.random.normal(k_w, (H, F), dtype=jnp.float32) * 0.05
    bias = jnp.zeros((F,), dtype=jnp.float32)        # nn.Parameter(torch.zeros(F))

    out = jax.block_until_ready(decoder_forward(hidden_rep, wpn_out, bias))
    ref = hidden_rep @ wpn_out + bias[None, :]
    assert out.shape == (B, F)
    assert jnp.allclose(out, ref, atol=1e-5, rtol=1e-5), "f32 mismatch"

    # Ragged num_features (200): edge tile is partial; the (H, F) operand is
    # NOT padded (no extra HBM pass).
    F2 = 200
    wpn_out2 = jax.random.normal(k_w, (H, F2), dtype=jnp.float32) * 0.05
    bias2 = jnp.full((F2,), 0.1, dtype=jnp.float32)
    out2 = jax.block_until_ready(decoder_forward(hidden_rep, wpn_out2, bias2))
    ref2 = hidden_rep @ wpn_out2 + bias2[None, :]
    assert out2.shape == (B, F2)
    assert jnp.allclose(out2, ref2, atol=1e-5, rtol=1e-5), "ragged-F mismatch"

    # bf16 weights straight "from the producer": halves HBM traffic on the
    # dominant operand; consumed natively by the MXU (no in-kernel upcast).
    wpn_out_bf16 = wpn_out.astype(jnp.bfloat16)   # stands in for a bf16-emitting WPN
    out3 = jax.block_until_ready(decoder_forward(hidden_rep, wpn_out_bf16, bias))
    ref3 = (hidden_rep.astype(jnp.bfloat16) @ wpn_out_bf16).astype(jnp.float32)
    assert out3.shape == (B, F)
    assert jnp.allclose(out3, ref3, atol=2e-2, rtol=2e-2), "bf16-weight mismatch"

    print("KERNEL_OK")
</pallas_src>

<mosaic_0001>
module attributes {stable_mosaic.version = 11 : i64} {
  func.func @decoder_kernel(%arg0: i32, %arg1: memref<8x32xf32, #tpu.memory_space<vmem>>, %arg2: memref<32x384xf32, #tpu.memory_space<vmem>>, %arg3: memref<1x384xf32, #tpu.memory_space<vmem>>, %arg4: memref<8x384xf32, #tpu.memory_space<vmem>>) attributes {dimension_semantics = [#tpu.dimension_semantics<parallel>], iteration_bounds = array<i64: 1>, scalar_prefetch = 0 : i64, scratch_operands = 0 : i64, tpu.core_type = #tpu.core_type<tc>, window_params = [{pipeline_mode = #tpu.pipeline_mode<synchronous>, transform_indices = @transform_0, window_bounds = array<i64: 8, 32>}, {transform_indices = @transform_1, window_bounds = array<i64: 32, 384>}, {transform_indices = @transform_2, window_bounds = array<i64: 1, 384>}, {transform_indices = @transform_3, window_bounds = array<i64: 8, 384>}]} {
    %c0 = arith.constant 0 : index
    %c0_0 = arith.constant 0 : index
    %0 = vector.load %arg1[%c0, %c0_0] : memref<8x32xf32, #tpu.memory_space<vmem>>, vector<8x32xf32>
    %c0_1 = arith.constant 0 : index
    %c0_2 = arith.constant 0 : index
    %1 = vector.load %arg2[%c0_1, %c0_2] : memref<32x384xf32, #tpu.memory_space<vmem>>, vector<32x384xf32>
    %cst = arith.constant dense<0.000000e+00> : vector<8x384xf32>
    %2 = tpu.matmul %0, %1, %cst {dimension_numbers = #tpu.dot_dimension_numbers<[1], [0], [0], [1], [0, 0, 1, 1], [], []>} : vector<8x32xf32>, vector<32x384xf32>, vector<8x384xf32> -> vector<8x384xf32>
    %c0_3 = arith.constant 0 : index
    %c0_4 = arith.constant 0 : index
    %3 = vector.load %arg3[%c0_3, %c0_4] : memref<1x384xf32, #tpu.memory_space<vmem>>, vector<1x384xf32>
    %4 = vector.broadcast %3 : vector<1x384xf32> to vector<8x384xf32>
    %5 = arith.addf %2, %4 : vector<8x384xf32>
    %c0_5 = arith.constant 0 : index
    %c0_6 = arith.constant 0 : index
    %6 = vector.load %arg4[%c0_5, %c0_6] : memref<8x384xf32, #tpu.memory_space<vmem>>, vector<8x384xf32>
    tpu.vector_store %arg4[%c0_5, %c0_6], %5 {strides = array<i32>} : memref<8x384xf32, #tpu.memory_space<vmem>>, vector<8x384xf32>,
    return
  }
  func.func @transform_0(%arg0: i32) -> (i32, i32) {
    %c0_i32 = arith.constant 0 : i32
    %c0_i32_0 = arith.constant 0 : i32
    %c0_i32_1 = arith.constant 0 : i32
    return %c0_i32, %c0_i32_0 : i32, i32
  }
  func.func @transform_1(%arg0: i32) -> (i32, i32) {
    %c0_i32 = arith.constant 0 : i32
    %c0_i32_0 = arith.constant 0 : i32
    return %c0_i32, %arg0 : i32, i32
  }
  func.func @transform_2(%arg0: i32) -> (i32, i32) {
    %c0_i32 = arith.constant 0 : i32
    %c0_i32_0 = arith.constant 0 : i32
    return %c0_i32, %arg0 : i32, i32
  }
  func.func @transform_3(%arg0: i32) -> (i32, i32) {
    %c0_i32 = arith.constant 0 : i32
    %c0_i32_0 = arith.constant 0 : i32
    return %c0_i32, %arg0 : i32, i32
  }
}

</mosaic_0001>

<bundles_post_ra>
// kernel: decoder_forward.1
= control target key start
LH: loop header
LB: loop body
LE: loop exit
PB: predicated region body
PF: predicated region fallthrough
CT: control target
= control target key end

     0   :  { %8 = vsyncpa [#allocation3], 0  ;;  %s274_s0 = inlined_call_operand.hbm [shape: f32[8,32], index: 0, kind: input, shape index: {}]   ;;  %s275_s1 = inlined_call_operand.hbm [shape: f32[32,384], index: 1, kind: input, shape index: {}]   ;;  %s276_s2 = inlined_call_operand.vmem [shape: f32[1,384], index: 2, kind: input, shape index: {}]   ;;  %s277_s3 = inlined_call_operand.hbm [shape: f32[8,384], index: 3, kind: output, shape index: {}]  }
   0x1   :  { %9 = vsyncpa [#allocation6], 0 }
   0x2   :  { %10 = vsyncpa [#allocation4], 0  ;;  %s16_s14 = sshll.u32 %s274_s0, 4  ;;  %s237_s15 = smov [#allocation2]   ;;  %s17_s14 = int_to_ptr.hbm [resolvable:$true] %s16_s14 }
   0x3   :  { %s18_s16 = sshll.u32 %s237_s15, 4  ;;  %s26_s19 = sshll.u32 %s275_s1, 4  ;;  %s19_s16 = int_to_ptr.vmem [resolvable:$true] %s18_s16  ;;  %s27_s19 = int_to_ptr.hbm [resolvable:$true] %s26_s19 }
   0x4   :  { %21 = dma.hbm_to_vmem [thread:$0]  %s17_s14, 128, %s19_s16, [#allocation3]  }
   0x5   :  { %s238_s20 = smov [#allocation5]   ;;  %s239_s22 = smov 384  }
   0x6   :  { %s28_s21 = sshll.u32 %s238_s20, 4  ;;  %s240_s23 = smov 24   ;;  %s29_s21 = int_to_ptr.vmem [resolvable:$true] %s28_s21 }
   0x7   :  { %34 = dma.hbm_to_vmem [thread:$0]  %s27_s19, 1536, %s29_s21, [#allocation6], %s239_s22, %s239_s22, %s240_s23  }
   0x8   :  { %231 = dma.done.wait [#allocation3], 128  }
   0x9   :  { %232 = vsyncadd [#allocation3], 4294967168 }
   0xa   :  { %233 = dma.done.wait [#allocation6], 1536  }
   0xb   :  { %234 = vsyncadd [#allocation6], 4294965760  ;;  %v57_v0 = vld [vmem:[#allocation5 + $0x58] sm:$0xff]  ;;  %v54_v1 = vld [vmem:[#allocation5 + $0x40] sm:$0xff]  ;;  %vm66_vm0 = vcmask 261120   ;;  %s241_s24 = smov [#allocation7]  }
   0xc   :  { %122 = vmatpush.msra.mxu2 %v57_v0  ;;  %v55_v2 = vld [vmem:[#allocation5 + $0x48] sm:$0xff]  ;;  %v56_v3 = vld [vmem:[#allocation5 + $0x50] sm:$0xff]  ;;  %v53_v6 = vld [vmem:[#allocation5 + $0x38] sm:$0xff]  ;;  %s138_s25 = sshll.u32 %s241_s24, 4  ;;  %s140_s28 = sshll.u32 %s277_s3, 4  ;;  %s139_s25 = int_to_ptr.vmem [resolvable:$true] %s138_s25  ;;  %s141_s28 = int_to_ptr.hbm [resolvable:$true] %s140_s28 }
   0xd   :  { %v51_v4 = vld [vmem:[#allocation5 + $0x28] sm:$0xff]  ;;  %82 = vmatpush.msra.mxu0 %v55_v2  ;;  %102 = vmatpush.msra.mxu1 %v56_v3  ;;  %v52_v5 = vld [vmem:[#allocation5 + $0x30] sm:$0xff]  ;;  %v49_v7 = vld [vmem:[#allocation5 + $0x18] sm:$0xff] }
   0xe   :  { %123 = vmatpush.msra.mxu2 %v54_v1  ;;  %v50_v8 = vld [vmem:[#allocation5 + $0x20] sm:$0xff]  ;;  %v48_v9 = vld [vmem:[#allocation5 + $0x10] sm:$0xff]  ;;  %v45_v10 = vld [vmem:[#allocation2] sm:$0xff] }
   0xf   :  { %83 = vmatpush.msra.mxu0 %v52_v5  ;;  %103 = vmatpush.msra.mxu1 %v53_v6  ;;  %v46_v11 = vld [vmem:[#allocation5] sm:$0xff]  ;;  %v47_v12 = vld [vmem:[#allocation5 + $0x8] sm:$0xff]  ;;  %v58_v13 = vld [vmem:[%s276_s2] sm:$0x7] }
  0x10   :  { %124 = vmatpush.msra.mxu2 %v51_v4  ;;  %v60_v14 = vperm.slane %v58_v13, 0  ;;  %v61_v15 = vperm.slane %v58_v13, 1  ;;  %v62_v20 = vperm.slane %v58_v13, 2 }
  0x11   :  { %84 = vmatpush.msra.mxu0 %v49_v7  ;;  %104 = vmatpush.msra.mxu1 %v50_v8 }
  0x12   :  { %125 = vmatpush.msra.mxu2 %v48_v9 }
  0x13   :  { %153 = vmatmul.msk.f32.vlgmr.msra.gmra.mxu2 %vm66_vm0, %v45_v10  ;;  %85 = vmatpush.msra.mxu0 %v46_v11 }
  0x14   :  { %105 = vmatpush.msra.mxu1 %v47_v12  ;;  %151 = vmatmul.msk.f32.vlgmr.msra.gmra.mxu0 %vm66_vm0, %v45_v10 }
  0x15   :  { %152 = vmatmul.msk.f32.vlgmr.msra.gmra.mxu1 %vm66_vm0, %v45_v10 }
  0x91   :  { %v87_v16 = vpop.f32.mrf.mxu0 }
  0x92   :  { %v88_v17 = vadd.f32 %v87_v16, %v60_v14  ;;  %v107_v18 = vpop.f32.mrf.mxu1 }
  0x93   :  { %v108_v19 = vadd.f32 %v107_v18, %v61_v15 }
  0x94   :  { %130 = vst [vmem:[#allocation7] sm:$0xff] %v88_v17 }
  0x95   :  { %131 = vst [vmem:[#allocation7 + $0x8] sm:$0xff] %v108_v19 }
  0x96   :  { %v127_v21 = vpop.f32.mrf.mxu2 }
  0x97   :  { %v128_v22 = vadd.f32 %v127_v21, %v62_v20 }
  0x99   :  { %132 = vst [vmem:[#allocation7 + $0x10] sm:$0xff] %v128_v22 }
  0x9a   :  { %143 = dma.vmem_to_hbm [thread:$0]  %s139_s25, 384, %s141_s28, [#allocation4]  }
  0x9b   :  { %235 = dma.done.wait [#allocation4], 384  }
  0x9c   :  { %236 = vsyncadd [#allocation4], 4294966912 }
  0x9d   :  { %148 = vsyncpa [#allocation3], 1 }
  0x9e   :  { %149 = vsyncpa [#allocation6], 1 }
  0x9f   :  { %150 = vsyncpa [#allocation4], 1 }

</bundles_post_ra>
